<compile_context>
chip_gen: v5e
topology: v5e:2x2
jax: 0.10.0
libtpu: 0.0.40
codegen_flags: <defaults>
</compile_context>

<pallas_src>
import functools

import jax
import jax.numpy as jnp
from jax import lax
from jax.experimental import pallas as pl
from jax.experimental.pallas import tpu as pltpu


def _mha_kernel(kv_ref, q_ref, wkT_ref, bk_ref, wqT_ref, bq_ref, wvT_ref, bv_ref,
                out_ref, scores_ref, keys_sc, vals_sc, *, scale, heads, lk):
    """One grid step = (batch element b, query tile qt).

    kv_ref     : (1, H*Lk, D)   head-major rows: row h*Lk + l
    q_ref      : (1, H, tq, D)
    w*T_ref    : (D, D)         pre-transposed: y = x @ W_T + b
    b*_ref     : (1, D)
    out_ref    : (1, tq, H*D)   == final 'b l (h d)' layout (lane-dense)
    scores_ref : (1, tq, H*Lk)  head-major along lanes (lane-dense)
    keys_sc    : (H*Lk, D) f32 scratch (persists across the qt axis)
    vals_sc    : (H*Lk, D) f32 scratch
    """
    # ---- fused K / V projections: one MXU matmul each, bias added once. ----
    # Cached in scratch; only recomputed at the first query tile of each batch.
    @pl.when(pl.program_id(1) == 0)
    def _():
        kv_s = kv_ref[0]                                            # (H*Lk, D)
        keys_sc[...] = (jnp.dot(kv_s, wkT_ref[...],
                                preferred_element_type=jnp.float32) + bk_ref[0])
        vals_sc[...] = (jnp.dot(kv_s, wvT_ref[...],
                                preferred_element_type=jnp.float32) + bv_ref[0])

    # ---- queries: the einsum sums the query head axis and wq/bq are shared,
    # so sum the raw heads first, project once, and pick the bias up H times.
    q_raw = q_ref[0, 0]
    for h in range(1, heads):                                       # small static unroll
        q_raw = q_raw + q_ref[0, h]                                 # (tq, D)
    q_sum = (jnp.dot(q_raw, wqT_ref[...],
                     preferred_element_type=jnp.float32)
             + heads * bq_ref[0]) * scale          # fold the 1/sqrt(D) scale here

    # ---- fused QK^T over all heads: (tq, D) x (H*Lk, D)^T -> (tq, H*Lk) ----
    logits = lax.dot_general(
        q_sum, keys_sc[...],
        dimension_numbers=(((1,), (1,)), ((), ())),
        preferred_element_type=jnp.float32,
    )

    # ---- per-head softmax on lane-contiguous Lk slices + PV matmul ----
    sm_parts = []
    attn_parts = []
    for h in range(heads):
        lg = logits[:, h * lk:(h + 1) * lk]                         # (tq, Lk)
        m = jnp.max(lg, axis=-1, keepdims=True)
        e = jnp.exp(lg - m)
        denom = jnp.sum(e, axis=-1, keepdims=True)
        sm = e * pl.reciprocal(denom, approx=True)                  # EUP, frees VALU
        attn = jnp.dot(sm, vals_sc[h * lk:(h + 1) * lk, :],
                       preferred_element_type=jnp.float32)          # (tq, D)
        sm_parts.append(sm)
        attn_parts.append(attn)

    # ---- single lane-dense stores ----
    scores_ref[0] = jnp.concatenate(sm_parts, axis=-1).astype(scores_ref.dtype)
    out_ref[0] = jnp.concatenate(attn_parts, axis=-1).astype(out_ref.dtype)


def _per_step_vmem_bytes(tq, heads, lk, d, d_model):
    f32 = 4
    return f32 * (2 * heads * lk * d        # kv input block (double buffered)
                  + 2 * heads * lk * d      # keys / values scratch
                  + 2 * heads * tq * d      # q input block
                  + 2 * tq * d_model        # output block
                  + 2 * tq * heads * lk     # scores block
                  + 3 * d * d + 3 * d)      # weights + biases


def _pick_q_tile(Lq, heads, lk, d, d_model, budget_bytes):
    """Largest query tile (a divisor of Lq) whose per-step VMEM fits the budget."""
    cands = [Lq] + [t for t in (512, 256, 128, 64, 32, 16, 8)
                    if t < Lq and Lq % t == 0]
    for tq in cands:
        if _per_step_vmem_bytes(tq, heads, lk, d, d_model) <= budget_bytes:
            return tq
    return cands[-1]


def multihead_attention(kv, q, params, heads):
    """kv: (B, Lk, d_model), q: (B, Lq, d_model). Returns (output, scores)."""
    B, Lk, d_model = kv.shape
    _, Lq, _ = q.shape
    assert d_model % heads == 0
    D = d_model // heads
    scale = 1.0 / (D ** 0.5)
    wk, bk, wq, bq, wv, bv = params

    # --- JAX glue (layout plumbing only) ---
    # kv as a (B, H*Lk, D) slab: row h*Lk + l holds head h, position l.
    kv_s = kv.reshape(B, Lk, heads, D).transpose(0, 2, 1, 3).reshape(B, heads * Lk, D)
    # q as (B, H, Lq, D); the kernel sums the head axis before projecting.
    q_r = q.reshape(B, Lq, heads, D).transpose(0, 2, 1, 3)
    wkT, wqT, wvT = wk.T, wq.T, wv.T
    bk2, bq2, bv2 = bk.reshape(1, D), bq.reshape(1, D), bv.reshape(1, D)

    # --- VMEM budget / tile selection (v7x has half the VMEM of v5e/v6e) ---
    try:
        vmem_cap = pltpu.get_tpu_info().vmem_capacity_bytes
    except Exception:
        vmem_cap = 64 * 1024 * 1024
    tq = _pick_q_tile(Lq, heads, Lk, D, d_model, int(0.6 * vmem_cap))
    nq = Lq // tq
    per_step = _per_step_vmem_bytes(tq, heads, Lk, D, d_model)
    vmem_limit = int(min(max(2 * per_step, 32 * 1024 * 1024), int(0.75 * vmem_cap)))

    kernel = functools.partial(_mha_kernel, scale=scale, heads=heads, lk=Lk)

    out, scores_slab = pl.pallas_call(
        kernel,
        grid=(B, nq),
        in_specs=[
            pl.BlockSpec((1, heads * Lk, D), lambda b, qt: (b, 0, 0)),
            pl.BlockSpec((1, heads, tq, D), lambda b, qt: (b, 0, qt, 0)),
            pl.BlockSpec((D, D), lambda b, qt: (0, 0)),
            pl.BlockSpec((1, D), lambda b, qt: (0, 0)),
            pl.BlockSpec((D, D), lambda b, qt: (0, 0)),
            pl.BlockSpec((1, D), lambda b, qt: (0, 0)),
            pl.BlockSpec((D, D), lambda b, qt: (0, 0)),
            pl.BlockSpec((1, D), lambda b, qt: (0, 0)),
        ],
        out_specs=[
            pl.BlockSpec((1, tq, d_model), lambda b, qt: (b, qt, 0)),
            pl.BlockSpec((1, tq, heads * Lk), lambda b, qt: (b, qt, 0)),
        ],
        out_shape=[
            jax.ShapeDtypeStruct((B, Lq, d_model), jnp.float32),
            jax.ShapeDtypeStruct((B, Lq, heads * Lk), jnp.float32),
        ],
        scratch_shapes=[
            pltpu.VMEM((heads * Lk, D), jnp.float32),
            pltpu.VMEM((heads * Lk, D), jnp.float32),
        ],
        compiler_params=pltpu.CompilerParams(
            dimension_semantics=("parallel", "arbitrary"),
            vmem_limit_bytes=vmem_limit),
    )(kv_s, q_r, wkT, bk2, wqT, bq2, wvT, bv2)

    # `out` is already in 'b l (h d)' layout. Scores: (B, Lq, H*Lk) -> (B, H, Lq, Lk).
    scores = scores_slab.reshape(B, Lq, heads, Lk).transpose(0, 2, 1, 3)
    return out, scores


def _reference_forward(kv, q, params, heads):
    """Pure-JAX mirror of the PyTorch forward (mask=None) for validation."""
    B, Lk, d_model = kv.shape
    _, Lq, _ = q.shape
    D = d_model // heads
    scale = 1.0 / (D ** 0.5)
    wk, bk, wq, bq, wv, bv = params
    kv_r = kv.reshape(B, Lk, heads, D).transpose(0, 2, 1, 3)
    q_r = q.reshape(B, Lq, heads, D).transpose(0, 2, 1, 3)
    keys = jnp.einsum('bhld,ed->bhle', kv_r, wk) + bk
    queries = jnp.einsum('bhld,ed->bhle', q_r, wq) + bq
    values = jnp.einsum('bhld,ed->bhle', kv_r, wv) + bv
    qkT = jnp.einsum('bhqd,blkd->blqk', queries, keys)   # query heads are summed
    scores = jax.nn.softmax(qkT * scale, axis=-1)
    attn = jnp.einsum('bhkd,bhqk->bhqd', values, scores)
    out = attn.transpose(0, 2, 1, 3).reshape(B, Lq, d_model)
    return out, scores


if __name__ == "__main__":
    B, L, d_model, heads = 2, 8, 32, 4
    D = d_model // heads

    key = jax.random.PRNGKey(0)
    k_kv, k_q, k_wk, k_bk, k_wq, k_bq, k_wv, k_bv = jax.random.split(key, 8)

    kv = jax.random.normal(k_kv, (B, L, d_model), dtype=jnp.float32)
    q = jax.random.normal(k_q, (B, L, d_model), dtype=jnp.float32)

    # deterministic synthetic parameters (PyTorch Linear convention: (out, in) + (out,))
    params = (
        jax.random.normal(k_wk, (D, D), dtype=jnp.float32) * 0.1,
        jax.random.normal(k_bk, (D,), dtype=jnp.float32) * 0.1,
        jax.random.normal(k_wq, (D, D), dtype=jnp.float32) * 0.1,
        jax.random.normal(k_bq, (D,), dtype=jnp.float32) * 0.1,
        jax.random.normal(k_wv, (D, D), dtype=jnp.float32) * 0.1,
        jax.random.normal(k_bv, (D,), dtype=jnp.float32) * 0.1,
    )

    out, scores = multihead_attention(kv, q, params, heads)
    out = jax.block_until_ready(out)
    scores = jax.block_until_ready(scores)

    ref_out, ref_scores = _reference_forward(kv, q, params, heads)
    assert out.shape == (B, L, d_model) and scores.shape == (B, heads, L, L)
    # tolerance loosened slightly for the approximate (EUP) reciprocal in softmax
    assert jnp.allclose(out, ref_out, atol=2e-3, rtol=2e-3)
    assert jnp.allclose(scores, ref_scores, atol=2e-3, rtol=2e-3)

    print("KERNEL_OK")
</pallas_src>

<mosaic_0001>
module attributes {stable_mosaic.version = 11 : i64} {
  func.func @_mha_kernel(%arg0: i32, %arg1: i32, %arg2: memref<1x32x8xf32, #tpu.memory_space<vmem>>, %arg3: memref<1x4x8x8xf32, #tpu.memory_space<vmem>>, %arg4: memref<8x8xf32, #tpu.memory_space<vmem>>, %arg5: memref<1x8xf32, #tpu.memory_space<vmem>>, %arg6: memref<8x8xf32, #tpu.memory_space<vmem>>, %arg7: memref<1x8xf32, #tpu.memory_space<vmem>>, %arg8: memref<8x8xf32, #tpu.memory_space<vmem>>, %arg9: memref<1x8xf32, #tpu.memory_space<vmem>>, %arg10: memref<1x8x32xf32, #tpu.memory_space<vmem>>, %arg11: memref<1x8x32xf32, #tpu.memory_space<vmem>>, %arg12: memref<32x8xf32, #tpu.memory_space<vmem>>, %arg13: memref<32x8xf32, #tpu.memory_space<vmem>>) attributes {dimension_semantics = [#tpu.dimension_semantics<parallel>, #tpu.dimension_semantics<arbitrary>], iteration_bounds = array<i64: 2, 1>, scalar_prefetch = 0 : i64, scratch_operands = 2 : i64, tpu.core_type = #tpu.core_type<tc>, window_params = [{transform_indices = @transform_0, window_bounds = array<i64: 1, 32, 8>}, {transform_indices = @transform_1, window_bounds = array<i64: 1, 4, 8, 8>}, {pipeline_mode = #tpu.pipeline_mode<synchronous>, transform_indices = @transform_2, window_bounds = array<i64: 8, 8>}, {pipeline_mode = #tpu.pipeline_mode<synchronous>, transform_indices = @transform_3, window_bounds = array<i64: 1, 8>}, {pipeline_mode = #tpu.pipeline_mode<synchronous>, transform_indices = @transform_4, window_bounds = array<i64: 8, 8>}, {pipeline_mode = #tpu.pipeline_mode<synchronous>, transform_indices = @transform_5, window_bounds = array<i64: 1, 8>}, {pipeline_mode = #tpu.pipeline_mode<synchronous>, transform_indices = @transform_6, window_bounds = array<i64: 8, 8>}, {pipeline_mode = #tpu.pipeline_mode<synchronous>, transform_indices = @transform_7, window_bounds = array<i64: 1, 8>}, {transform_indices = @transform_8, window_bounds = array<i64: 1, 8, 32>}, {transform_indices = @transform_9, window_bounds = array<i64: 1, 8, 32>}]} {
    %c0_i32 = arith.constant 0 : i32
    %0 = arith.cmpi eq, %arg1, %c0_i32 : i32
    %1 = arith.extui %0 : i1 to i32
    %c0_i32_0 = arith.constant 0 : i32
    %2 = arith.cmpi ne, %1, %c0_i32_0 : i32
    scf.if %2 {
      %c0_45 = arith.constant 0 : index
      %c0_46 = arith.constant 0 : index
      %c0_47 = arith.constant 0 : index
      %87 = vector.load %arg2[%c0_45, %c0_46, %c0_47] : memref<1x32x8xf32, #tpu.memory_space<vmem>>, vector<1x32x8xf32>
      %88 = vector.shape_cast %87 : vector<1x32x8xf32> to vector<32x8xf32>
      %c0_48 = arith.constant 0 : index
      %c0_49 = arith.constant 0 : index
      %89 = vector.load %arg4[%c0_48, %c0_49] : memref<8x8xf32, #tpu.memory_space<vmem>>, vector<8x8xf32>
      %cst_50 = arith.constant dense<0.000000e+00> : vector<32x8xf32>
      %90 = tpu.matmul %88, %89, %cst_50 {dimension_numbers = #tpu.dot_dimension_numbers<[1], [0], [0], [1], [0, 0, 1, 1], [], []>} : vector<32x8xf32>, vector<8x8xf32>, vector<32x8xf32> -> vector<32x8xf32>
      %c0_51 = arith.constant 0 : index
      %c0_52 = arith.constant 0 : index
      %91 = vector.load %arg5[%c0_51, %c0_52] : memref<1x8xf32, #tpu.memory_space<vmem>>, vector<1x8xf32>
      %92 = vector.shape_cast %91 : vector<1x8xf32> to vector<8xf32>
      %93 = vector.shape_cast %92 : vector<8xf32> to vector<1x8xf32>
      %94 = vector.broadcast %93 : vector<1x8xf32> to vector<32x8xf32>
      %95 = arith.addf %90, %94 : vector<32x8xf32>
      %c0_53 = arith.constant 0 : index
      %c0_54 = arith.constant 0 : index
      %96 = vector.load %arg12[%c0_53, %c0_54] : memref<32x8xf32, #tpu.memory_space<vmem>>, vector<32x8xf32>
      tpu.vector_store %arg12[%c0_53, %c0_54], %95 {strides = array<i32>} : memref<32x8xf32, #tpu.memory_space<vmem>>, vector<32x8xf32>,
      %c0_55 = arith.constant 0 : index
      %c0_56 = arith.constant 0 : index
      %97 = vector.load %arg8[%c0_55, %c0_56] : memref<8x8xf32, #tpu.memory_space<vmem>>, vector<8x8xf32>
      %cst_57 = arith.constant dense<0.000000e+00> : vector<32x8xf32>
      %98 = tpu.matmul %88, %97, %cst_57 {dimension_numbers = #tpu.dot_dimension_numbers<[1], [0], [0], [1], [0, 0, 1, 1], [], []>} : vector<32x8xf32>, vector<8x8xf32>, vector<32x8xf32> -> vector<32x8xf32>
      %c0_58 = arith.constant 0 : index
      %c0_59 = arith.constant 0 : index
      %99 = vector.load %arg9[%c0_58, %c0_59] : memref<1x8xf32, #tpu.memory_space<vmem>>, vector<1x8xf32>
      %100 = vector.shape_cast %99 : vector<1x8xf32> to vector<8xf32>
      %101 = vector.shape_cast %100 : vector<8xf32> to vector<1x8xf32>
      %102 = vector.broadcast %101 : vector<1x8xf32> to vector<32x8xf32>
      %103 = arith.addf %98, %102 : vector<32x8xf32>
      %c0_60 = arith.constant 0 : index
      %c0_61 = arith.constant 0 : index
      %104 = vector.load %arg13[%c0_60, %c0_61] : memref<32x8xf32, #tpu.memory_space<vmem>>, vector<32x8xf32>
      tpu.vector_store %arg13[%c0_60, %c0_61], %103 {strides = array<i32>} : memref<32x8xf32, #tpu.memory_space<vmem>>, vector<32x8xf32>,
    } else {
    }
    %c0 = arith.constant 0 : index
    %c0_1 = arith.constant 0 : index
    %c0_2 = arith.constant 0 : index
    %c0_3 = arith.constant 0 : index
    %3 = vector.load %arg3[%c0, %c0_1, %c0_2, %c0_3] : memref<1x4x8x8xf32, #tpu.memory_space<vmem>>, vector<1x1x8x8xf32>
    %4 = vector.shape_cast %3 : vector<1x1x8x8xf32> to vector<8x8xf32>
    %c0_4 = arith.constant 0 : index
    %c1 = arith.constant 1 : index
    %c0_5 = arith.constant 0 : index
    %c0_6 = arith.constant 0 : index
    %5 = vector.load %arg3[%c0_4, %c1, %c0_5, %c0_6] : memref<1x4x8x8xf32, #tpu.memory_space<vmem>>, vector<1x1x8x8xf32>
    %6 = vector.shape_cast %5 : vector<1x1x8x8xf32> to vector<8x8xf32>
    %7 = arith.addf %4, %6 : vector<8x8xf32>
    %c0_7 = arith.constant 0 : index
    %c2 = arith.constant 2 : index
    %c0_8 = arith.constant 0 : index
    %c0_9 = arith.constant 0 : index
    %8 = vector.load %arg3[%c0_7, %c2, %c0_8, %c0_9] : memref<1x4x8x8xf32, #tpu.memory_space<vmem>>, vector<1x1x8x8xf32>
    %9 = vector.shape_cast %8 : vector<1x1x8x8xf32> to vector<8x8xf32>
    %10 = arith.addf %7, %9 : vector<8x8xf32>
    %c0_10 = arith.constant 0 : index
    %c3 = arith.constant 3 : index
    %c0_11 = arith.constant 0 : index
    %c0_12 = arith.constant 0 : index
    %11 = vector.load %arg3[%c0_10, %c3, %c0_11, %c0_12] : memref<1x4x8x8xf32, #tpu.memory_space<vmem>>, vector<1x1x8x8xf32>
    %12 = vector.shape_cast %11 : vector<1x1x8x8xf32> to vector<8x8xf32>
    %13 = arith.addf %10, %12 : vector<8x8xf32>
    %c0_13 = arith.constant 0 : index
    %c0_14 = arith.constant 0 : index
    %14 = vector.load %arg6[%c0_13, %c0_14] : memref<8x8xf32, #tpu.memory_space<vmem>>, vector<8x8xf32>
    %cst = arith.constant dense<0.000000e+00> : vector<8x8xf32>
    %15 = tpu.matmul %13, %14, %cst {dimension_numbers = #tpu.dot_dimension_numbers<[1], [0], [0], [1], [0, 0, 1, 1], [], []>} : vector<8x8xf32>, vector<8x8xf32>, vector<8x8xf32> -> vector<8x8xf32>
    %c0_15 = arith.constant 0 : index
    %c0_16 = arith.constant 0 : index
    %16 = vector.load %arg7[%c0_15, %c0_16] : memref<1x8xf32, #tpu.memory_space<vmem>>, vector<1x8xf32>
    %17 = vector.shape_cast %16 : vector<1x8xf32> to vector<8xf32>
    %cst_17 = arith.constant 4.000000e+00 : f32
    %18 = vector.broadcast %cst_17 : f32 to vector<8xf32>
    %19 = arith.mulf %18, %17 : vector<8xf32>
    %20 = vector.shape_cast %19 : vector<8xf32> to vector<1x8xf32>
    %21 = vector.broadcast %20 : vector<1x8xf32> to vector<8x8xf32>
    %22 = arith.addf %15, %21 : vector<8x8xf32>
    %cst_18 = arith.constant 0.353553385 : f32
    %23 = vector.broadcast %cst_18 : f32 to vector<8x8xf32>
    %24 = arith.mulf %22, %23 : vector<8x8xf32>
    %c0_19 = arith.constant 0 : index
    %c0_20 = arith.constant 0 : index
    %25 = vector.load %arg12[%c0_19, %c0_20] : memref<32x8xf32, #tpu.memory_space<vmem>>, vector<32x8xf32>
    %cst_21 = arith.constant dense<0.000000e+00> : vector<8x32xf32>
    %26 = tpu.matmul %24, %25, %cst_21 {dimension_numbers = #tpu.dot_dimension_numbers<[1], [1], [0], [0], [0, 0, 1, 0], [], []>} : vector<8x8xf32>, vector<32x8xf32>, vector<8x32xf32> -> vector<8x32xf32>
    %27 = vector.extract_strided_slice %26 {offsets = [0, 0], sizes = [8, 8], strides = [1, 1]} : vector<8x32xf32> to vector<8x8xf32>
    %cst_22 = arith.constant dense<0xFF800000> : vector<8xf32>
    %28 = vector.multi_reduction <maximumf>, %27, %cst_22 [1] : vector<8x8xf32> to vector<8xf32>
    %29 = vector.shape_cast %28 : vector<8xf32> to vector<8x1xf32>
    %30 = vector.broadcast %29 : vector<8x1xf32> to vector<8x8xf32>
    %31 = arith.subf %27, %30 : vector<8x8xf32>
    %32 = math.exp %31 : vector<8x8xf32>
    %cst_23 = arith.constant dense<0.000000e+00> : vector<8xf32>
    %33 = vector.multi_reduction <add>, %32, %cst_23 [1] : vector<8x8xf32> to vector<8xf32>
    %34 = vector.shape_cast %33 : vector<8xf32> to vector<8x1xf32>
    %35 = tpu.reciprocal %34 {approx = true} : vector<8x1xf32> -> vector<8x1xf32>
    %36 = vector.broadcast %35 : vector<8x1xf32> to vector<8x8xf32>
    %37 = arith.mulf %32, %36 : vector<8x8xf32>
    %c0_24 = arith.constant 0 : index
    %c0_25 = arith.constant 0 : index
    %38 = vector.load %arg13[%c0_24, %c0_25] : memref<32x8xf32, #tpu.memory_space<vmem>>, vector<8x8xf32>
    %cst_26 = arith.constant dense<0.000000e+00> : vector<8x8xf32>
    %39 = tpu.matmul %37, %38, %cst_26 {dimension_numbers = #tpu.dot_dimension_numbers<[1], [0], [0], [1], [0, 0, 1, 1], [], []>} : vector<8x8xf32>, vector<8x8xf32>, vector<8x8xf32> -> vector<8x8xf32>
    %40 = vector.extract_strided_slice %26 {offsets = [0, 8], sizes = [8, 8], strides = [1, 1]} : vector<8x32xf32> to vector<8x8xf32>
    %cst_27 = arith.constant dense<0xFF800000> : vector<8xf32>
    %41 = vector.multi_reduction <maximumf>, %40, %cst_27 [1] : vector<8x8xf32> to vector<8xf32>
    %42 = vector.shape_cast %41 : vector<8xf32> to vector<8x1xf32>
    %43 = vector.broadcast %42 : vector<8x1xf32> to vector<8x8xf32>
    %44 = arith.subf %40, %43 : vector<8x8xf32>
    %45 = math.exp %44 : vector<8x8xf32>
    %cst_28 = arith.constant dense<0.000000e+00> : vector<8xf32>
    %46 = vector.multi_reduction <add>, %45, %cst_28 [1] : vector<8x8xf32> to vector<8xf32>
    %47 = vector.shape_cast %46 : vector<8xf32> to vector<8x1xf32>
    %48 = tpu.reciprocal %47 {approx = true} : vector<8x1xf32> -> vector<8x1xf32>
    %49 = vector.broadcast %48 : vector<8x1xf32> to vector<8x8xf32>
    %50 = arith.mulf %45, %49 : vector<8x8xf32>
    %c8 = arith.constant 8 : index
    %c0_29 = arith.constant 0 : index
    %51 = vector.load %arg13[%c8, %c0_29] : memref<32x8xf32, #tpu.memory_space<vmem>>, vector<8x8xf32>
    %cst_30 = arith.constant dense<0.000000e+00> : vector<8x8xf32>
    %52 = tpu.matmul %50, %51, %cst_30 {dimension_numbers = #tpu.dot_dimension_numbers<[1], [0], [0], [1], [0, 0, 1, 1], [], []>} : vector<8x8xf32>, vector<8x8xf32>, vector<8x8xf32> -> vector<8x8xf32>
    %53 = vector.extract_strided_slice %26 {offsets = [0, 16], sizes = [8, 8], strides = [1, 1]} : vector<8x32xf32> to vector<8x8xf32>
    %cst_31 = arith.constant dense<0xFF800000> : vector<8xf32>
    %54 = vector.multi_reduction <maximumf>, %53, %cst_31 [1] : vector<8x8xf32> to vector<8xf32>
    %55 = vector.shape_cast %54 : vector<8xf32> to vector<8x1xf32>
    %56 = vector.broadcast %55 : vector<8x1xf32> to vector<8x8xf32>
    %57 = arith.subf %53, %56 : vector<8x8xf32>
    %58 = math.exp %57 : vector<8x8xf32>
    %cst_32 = arith.constant dense<0.000000e+00> : vector<8xf32>
    %59 = vector.multi_reduction <add>, %58, %cst_32 [1] : vector<8x8xf32> to vector<8xf32>
    %60 = vector.shape_cast %59 : vector<8xf32> to vector<8x1xf32>
    %61 = tpu.reciprocal %60 {approx = true} : vector<8x1xf32> -> vector<8x1xf32>
    %62 = vector.broadcast %61 : vector<8x1xf32> to vector<8x8xf32>
    %63 = arith.mulf %58, %62 : vector<8x8xf32>
    %c16 = arith.constant 16 : index
    %c0_33 = arith.constant 0 : index
    %64 = vector.load %arg13[%c16, %c0_33] : memref<32x8xf32, #tpu.memory_space<vmem>>, vector<8x8xf32>
    %cst_34 = arith.constant dense<0.000000e+00> : vector<8x8xf32>
    %65 = tpu.matmul %63, %64, %cst_34 {dimension_numbers = #tpu.dot_dimension_numbers<[1], [0], [0], [1], [0, 0, 1, 1], [], []>} : vector<8x8xf32>, vector<8x8xf32>, vector<8x8xf32> -> vector<8x8xf32>
    %66 = vector.extract_strided_slice %26 {offsets = [0, 24], sizes = [8, 8], strides = [1, 1]} : vector<8x32xf32> to vector<8x8xf32>
    %cst_35 = arith.constant dense<0xFF800000> : vector<8xf32>
    %67 = vector.multi_reduction <maximumf>, %66, %cst_35 [1] : vector<8x8xf32> to vector<8xf32>
    %68 = vector.shape_cast %67 : vector<8xf32> to vector<8x1xf32>
    %69 = vector.broadcast %68 : vector<8x1xf32> to vector<8x8xf32>
    %70 = arith.subf %66, %69 : vector<8x8xf32>
    %71 = math.exp %70 : vector<8x8xf32>
    %cst_36 = arith.constant dense<0.000000e+00> : vector<8xf32>
    %72 = vector.multi_reduction <add>, %71, %cst_36 [1] : vector<8x8xf32> to vector<8xf32>
    %73 = vector.shape_cast %72 : vector<8xf32> to vector<8x1xf32>
    %74 = tpu.reciprocal %73 {approx = true} : vector<8x1xf32> -> vector<8x1xf32>
    %75 = vector.broadcast %74 : vector<8x1xf32> to vector<8x8xf32>
    %76 = arith.mulf %71, %75 : vector<8x8xf32>
    %c24 = arith.constant 24 : index
    %c0_37 = arith.constant 0 : index
    %77 = vector.load %arg13[%c24, %c0_37] : memref<32x8xf32, #tpu.memory_space<vmem>>, vector<8x8xf32>
    %cst_38 = arith.constant dense<0.000000e+00> : vector<8x8xf32>
    %78 = tpu.matmul %76, %77, %cst_38 {dimension_numbers = #tpu.dot_dimension_numbers<[1], [0], [0], [1], [0, 0, 1, 1], [], []>} : vector<8x8xf32>, vector<8x8xf32>, vector<8x8xf32> -> vector<8x8xf32>
    %79 = tpu.concatenate %37, %50, %63, %76 in 1 : vector<8x8xf32>, vector<8x8xf32>, vector<8x8xf32>, vector<8x8xf32> -> vector<8x32xf32>
    %c0_39 = arith.constant 0 : index
    %c0_40 = arith.constant 0 : index
    %c0_41 = arith.constant 0 : index
    %80 = vector.load %arg11[%c0_39, %c0_40, %c0_41] : memref<1x8x32xf32, #tpu.memory_space<vmem>>, vector<1x8x32xf32>
    %81 = vector.shape_cast %80 : vector<1x8x32xf32> to vector<8x32xf32>
    %82 = vector.shape_cast %79 : vector<8x32xf32> to vector<1x8x32xf32>
    tpu.vector_store %arg11[%c0_39, %c0_40, %c0_41], %82 {strides = array<i32>} : memref<1x8x32xf32, #tpu.memory_space<vmem>>, vector<1x8x32xf32>,
    %83 = tpu.concatenate %39, %52, %65, %78 in 1 : vector<8x8xf32>, vector<8x8xf32>, vector<8x8xf32>, vector<8x8xf32> -> vector<8x32xf32>
    %c0_42 = arith.constant 0 : index
    %c0_43 = arith.constant 0 : index
    %c0_44 = arith.constant 0 : index
    %84 = vector.load %arg10[%c0_42, %c0_43, %c0_44] : memref<1x8x32xf32, #tpu.memory_space<vmem>>, vector<1x8x32xf32>
    %85 = vector.shape_cast %84 : vector<1x8x32xf32> to vector<8x32xf32>
    %86 = vector.shape_cast %83 : vector<8x32xf32> to vector<1x8x32xf32>
    tpu.vector_store %arg10[%c0_42, %c0_43, %c0_44], %86 {strides = array<i32>} : memref<1x8x32xf32, #tpu.memory_space<vmem>>, vector<1x8x32xf32>,
    return
  }
  func.func @transform_0(%arg0: i32, %arg1: i32) -> (i32, i32, i32) {
    %c0_i32 = arith.constant 0 : i32
    %c0_i32_0 = arith.constant 0 : i32
    %c0_i32_1 = arith.constant 0 : i32
    return %arg0, %c0_i32, %c0_i32_0 : i32, i32, i32
  }
  func.func @transform_1(%arg0: i32, %arg1: i32) -> (i32, i32, i32, i32) {
    %c0_i32 = arith.constant 0 : i32
    %c0_i32_0 = arith.constant 0 : i32
    %c0_i32_1 = arith.constant 0 : i32
    return %arg0, %c0_i32, %arg1, %c0_i32_0 : i32, i32, i32, i32
  }
  func.func @transform_2(%arg0: i32, %arg1: i32) -> (i32, i32) {
    %c0_i32 = arith.constant 0 : i32
    %c0_i32_0 = arith.constant 0 : i32
    %c0_i32_1 = arith.constant 0 : i32
    return %c0_i32, %c0_i32_0 : i32, i32
  }
  func.func @transform_3(%arg0: i32, %arg1: i32) -> (i32, i32) {
    %c0_i32 = arith.constant 0 : i32
    %c0_i32_0 = arith.constant 0 : i32
    %c0_i32_1 = arith.constant 0 : i32
    return %c0_i32, %c0_i32_0 : i32, i32
  }
  func.func @transform_4(%arg0: i32, %arg1: i32) -> (i32, i32) {
    %c0_i32 = arith.constant 0 : i32
    %c0_i32_0 = arith.constant 0 : i32
    %c0_i32_1 = arith.constant 0 : i32
    return %c0_i32, %c0_i32_0 : i32, i32
  }
  func.func @transform_5(%arg0: i32, %arg1: i32) -> (i32, i32) {
    %c0_i32 = arith.constant 0 : i32
    %c0_i32_0 = arith.constant 0 : i32
    %c0_i32_1 = arith.constant 0 : i32
    return %c0_i32, %c0_i32_0 : i32, i32
  }
  func.func @transform_6(%arg0: i32, %arg1: i32) -> (i32, i32) {
    %c0_i32 = arith.constant 0 : i32
    %c0_i32_0 = arith.constant 0 : i32
    %c0_i32_1 = arith.constant 0 : i32
    return %c0_i32, %c0_i32_0 : i32, i32
  }
  func.func @transform_7(%arg0: i32, %arg1: i32) -> (i32, i32) {
    %c0_i32 = arith.constant 0 : i32
    %c0_i32_0 = arith.constant 0 : i32
    %c0_i32_1 = arith.constant 0 : i32
    return %c0_i32, %c0_i32_0 : i32, i32
  }
  func.func @transform_8(%arg0: i32, %arg1: i32) -> (i32, i32, i32) {
    %c0_i32 = arith.constant 0 : i32
    %c0_i32_0 = arith.constant 0 : i32
    return %arg0, %arg1, %c0_i32 : i32, i32, i32
  }
  func.func @transform_9(%arg0: i32, %arg1: i32) -> (i32, i32, i32) {
    %c0_i32 = arith.constant 0 : i32
    %c0_i32_0 = arith.constant 0 : i32
    return %arg0, %arg1, %c0_i32 : i32, i32, i32
  }
}

</mosaic_0001>

<bundles_post_ra>
// kernel: tpu_custom_call.1
= control target key start
LH: loop header
LB: loop body
LE: loop exit
PB: predicated region body
PF: predicated region fallthrough
CT: control target
= control target key end

     0   :  { %s1467_s0 = inlined_call_operand.vmem [shape: f32[2,32,8], index: 0, kind: input, shape index: {}]   ;;  %s1468_s1 = inlined_call_operand.vmem [shape: f32[2,4,8,8], index: 1, kind: input, shape index: {}]   ;;  %s1469_s2 = inlined_call_operand.vmem [shape: f32[8,8], index: 2, kind: input, shape index: {}]   ;;  %s1470_s3 = inlined_call_operand.vmem [shape: f32[1,8], index: 3, kind: input, shape index: {}]   ;;  %s1471_s4 = inlined_call_operand.vmem [shape: f32[8,8], index: 4, kind: input, shape index: {}]   ;;  %s1472_s5 = inlined_call_operand.vmem [shape: f32[1,8], index: 5, kind: input, shape index: {}]   ;;  %s1473_s6 = inlined_call_operand.hbm [shape: f32[8,8], index: 6, kind: input, shape index: {}]   ;;  %s1474_s7 = inlined_call_operand.vmem [shape: f32[1,8], index: 7, kind: input, shape index: {}]   ;;  %s1475_s8 = inlined_call_operand.hbm [shape: f32[2,8,32], index: 8, kind: output, shape index: {0}]   ;;  %s1476_s9 = inlined_call_operand.hbm [shape: f32[2,8,32], index: 9, kind: output, shape index: {1}]  }
   0x1   :  { %1478 = sst [smem:[#allocation13_spill]] %s1467_s0 }
   0x2   :  { %1479 = sst [smem:[#allocation14_spill]] %s1473_s6 }
   0x3   :  { %15 = vsyncpa [#allocation5], 0 }
   0x4   :  { %16 = vsyncpa [#allocation6], 0 }
   0x5   :  { %18 = vsyncpa [#allocation6 + $0x1], 0 }
   0x6   :  { %19 = vsyncpa [#allocation9], 0 }
   0x7   :  { %21 = vsyncpa [#allocation9 + $0x1], 0  ;;  %s1274_s30 = smov 0   ;;  %s1276_s10 = smov 0  }
   0x8   :  { %s1278_s11 = smov 0   ;;  %s1280_s12 = smov 0  }
   0x9   :  { %s1282_s13 = smov 0   ;;  %s1284_s14 = smov 0  }
   0xa LB: > { %s934_s15 = sadd.s32 4294967295, %s1215_s14   ;;  %s935_s16 = sadd.s32 4294967294, %s1215_s14   ;;  %s1215_s14 = sphi %s1284_s14, %s27_s14   ;;  %s1211_s13 = sphi %s1282_s13, %s1489_s13   ;;  %s1207_s12 = sphi %s1280_s12, %s1488_s12   ;;  %s1203_s11 = sphi %s1278_s11, %s1487_s11   ;;  %s1199_s10 = sphi %s1276_s10, %s1486_s10   ;;  %s1195_s30 = sphi %s1274_s30, %s1485_s30  }
   0xb   : > { %s39_s17 = sadd.s32 1, %s1211_s13  ;;  %s228_s18 = sadd.s32 1, %s1203_s11 }
   0xc   : > { %p41_p0 = scmp.ge.s32.totalorder %s39_s17, 2  ;;  %p238_p1 = scmp.ne.s32.totalorder %s1203_s11, %s1199_s10 }
   0xd   : > { %p239_p2 = scmp.eq.s32.totalorder %s934_s15, 1  ;;  %p244_p3 = scmp.ne.s32.totalorder %s1199_s10, %s1195_s30 }
   0xe   : > { %s1491_s17 = smov (%p41_p0, %s39_s17), 0  ;;  %p245_p5 = scmp.eq.s32.totalorder %s935_s16, 1 }
   0xf   : > { %p1314_p4 = por %p239_p2, %p238_p1  ;;  %s223_s20 = ssub.s32 %s1211_s13, %s1491_s17 }
  0x10   : > { %p936_p6 = scmp.ge.s32.totalorder %s1215_s14, 1  ;;  %p226_p7 = scmp.eq.s32.totalorder %s223_s20, 0 }
  0x11   : > { %p1321_p8 = por %p245_p5, %p244_p3  ;;  %p280_p9 = scmp.lt.s32.totalorder %s1215_s14, 3 }
  0x12   : > { %s1327_s22 = scalar_select %p226_p7, %s1203_s11, %s228_s18  }
  0x13   : > { %p281_p10 = pnand %p936_p6, %p280_p9  ;;  %p995_p11 = scmp.eq.s32.totalorder %s934_s15, 0 }
  0x14   : > { %s1482_s6 = sld [smem:[#allocation14_spill]]  ;;  %s1217_s26 = smov [#allocation4]  }
  0x15   : > { %p984_p12 = pneg %p281_p10  ;;  %s306_s27 = sshll.u32 %s1217_s26, 4  ;;  %s307_s27 = int_to_ptr.vmem [resolvable:$true] %s306_s27 }
  0x17   : > { %p985_p13 = pnand %p995_p11, %p984_p12  ;;  %341 = sbr.rel (%p281_p10) target bundleno = 1087 (0x43f), region = 52 }
  0x1a   : > { %s304_s25 = sshll.u32 %s1482_s6, 4  ;;  %s305_s25 = int_to_ptr.hbm [resolvable:$true] %s304_s25 }
  0x1b   : > { %987 = dma.hbm_to_vmem [thread:$0]  (!%p985_p13), %s305_s25, 128, %s307_s27, [#allocation5]  }
  0x1c   : > { %1182 = dma.done.wait (%p995_p11), [#allocation5], 128  }
  0x1d   : > { %1184 = vsyncadd (%p995_p11), [#allocation5], 4294967168  ;;  %p391_p0 = scmp.lt.s32.totalorder %s1207_s12, 1  ;;  %s1483_s0 = sld [smem:[#allocation13_spill]]  ;;  %vm417_vm0 = vcmask 64512   ;;  %v412_v0 = vld [vmem:[%s1469_s2] sm:$0xff] }
  0x1e   : > { %445 = vmatpush.msra.mxu0 %v412_v0  ;;  %v511_v2 = vld [vmem:[%s1471_s4] sm:$0xff]  ;;  %vm700_vm1 = vcmask 261312   ;;  %vm616_vm2 = vcmask 130112   ;;  %vm658_vm3 = vcmask 195712   ;;  %s1218_s16 = smov 120   ;;  %s1220_s20 = smov 104  }
  0x1f   : > { %s392_s28 = scalar_select %p391_p0, %s1207_s12, 1  ;;  %536 = vmatpush.msra.mxu2 %v511_v2  ;;  %v1053_v13 = vld [vmem:[%s1470_s3] ss:$0 sm:$0xff]  ;;  %vm743_vm4 = vcmask 130048   ;;  %vm745_vm5 = vcmask 195584   ;;  %vm747_vm6 = vcmask 261120  }
  0x20   : > { %v512_v22 = vld [vmem:[%s1472_s5] sm:$0x1]  ;;  %s1390_s26 = sand.u32 1, %s1199_s10   ;;  %s1221_s6 = smov 16  }
  0x21   : > { %s974_s29 = sshll.u32 %s392_s28, 5  ;;  %v513_v24 = vmul.f32 4.0, %v512_v22  ;;  %v463_v37 = vld [vmem:[#allocation4] sm:$0xff]  ;;  %s1477_s25 = sshll.u32 %s1390_s26, 3 }
  0x22   : > { %s403_s24 = scalar_lea.vmem %s1468_s1, %s974_s29  ;;  %483 = vmatpush.msra.mxu1 %v463_v37  ;;  %v1054_v59 = vld [vmem:[%s1474_s7] ss:$0 sm:$0xff]  ;;  %s1399_s27 = scalar_lea.vmem [#allocation8], %s1477_s25 }
  0x23   : > { %s395_s18 = scalar_lea.vmem %s1483_s0, %s974_s29  ;;  %v501_v3 = vld [vmem:[%s403_s24] sm:$0xff]  ;;  %v955_v4 = vld [vmem:[%s403_s24 + $0x8] sm:$0xff]  ;;  %v956_v5 = vld [vmem:[%s403_s24 + $0x10] sm:$0xff]  ;;  %v515_v26 = vperm.slane %v513_v24, 0  ;;  %s970_s28 = sshll.u32 %s1207_s12, 3 }
  0x24   : > { %v408_v1 = vld [vmem:[%s395_s18] sm:$0xff]  ;;  %v504_v6 = vadd.f32 %v955_v4, %v501_v3  ;;  %v957_v7 = vld [vmem:[%s403_s24 + $0x18] sm:$0xff]  ;;  %v409_v9 = vld [vmem:[%s395_s18 + $0x8] sm:$0xff]  ;;  %s1222_s23 = smov 8   ;;  %s771_s24 = scalar_lea.sflag [#allocation9], %s1390_s26 }
  0x25   : > { %947 = vmatmul.msk.f32.vlgmr.msra.gmra.mxu0 %vm417_vm0, %v408_v1  ;;  %v410_v11 = vld [vmem:[%s395_s18 + $0x10] sm:$0xff]  ;;  %v1350_v12 = vld [vmem:[%s395_s18 + $0x18] sm:$0xff]  ;;  %951 = vmatmul.msk.f32.vlgmr.msra.gmra.mxu1 %vm417_vm0, %v408_v1  ;;  %s1219_s18 = smov 112   ;;  %s1121_s29 = scalar_lea.hbm %s1476_s9, 16 }
  0x26   : > { %v507_v8 = vadd.f32 %v956_v5, %v504_v6 }
  0x28   : > { %v510_v10 = vadd.f32 %v957_v7, %v507_v8 }
  0x2a   : > { %958 = vmatmul.msk.f32.vlgmr.msra.gmra.mxu2 %vm417_vm0, %v510_v10 }
  0x2d   : > { %948 = vmatmul.msk.f32.gmra.mxu0 %vm417_vm0, %v409_v9  ;;  %952 = vmatmul.msk.f32.gmra.mxu1 %vm417_vm0, %v409_v9 }
  0x35   : > { %949 = vmatmul.msk.f32.gmra.mxu0 %vm417_vm0, %v410_v11  ;;  %953 = vmatmul.msk.f32.gmra.mxu1 %vm417_vm0, %v410_v11 }
  0x3d   : > { %950 = vmatmul.msk.f32.gmra.mxu0 %vm417_vm0, %v1350_v12  ;;  %954 = vmatmul.msk.f32.gmra.mxu1 %vm417_vm0, %v1350_v12 }
  0xa2   : > { %v447_v14 = vpop.f32.mrf.mxu0  ;;  %v485_v60 = vpop.f32.mrf.mxu1 }
  0xa3   : > { %v448_v15 = vadd.f32 %v1053_v13, %v447_v14  ;;  %v486_v61 = vadd.f32 %v1054_v59, %v485_v60 }
  0xa5   : > { %459 = vst.msk [vmem:[#allocation2] sm:$0xff] %vm417_vm0, %v448_v15 }
  0xa6   : > { %497 = vst.msk [vmem:[#allocation3] sm:$0xff] %vm417_vm0, %v486_v61 }
  0xaa   : > { %v450_v16 = vpop.f32.mrf.mxu0  ;;  %v488_v5 = vpop.f32.mrf.mxu1 }
  0xab   : > { %v451_v17 = vadd.f32 %v1053_v13, %v450_v16  ;;  %v489_v6 = vadd.f32 %v1054_v59, %v488_v5 }
  0xac   : > { %v542_v31 = vld [vmem:[#allocation2] sm:$0xff] }
  0xad   : > { %460 = vst.msk [vmem:[#allocation2 + $0x8] sm:$0xff] %vm417_vm0, %v451_v17  ;;  %v538_v27 = vpop.f32.mrf.mxu2  ;;  %v592_v0 = vld [vmem:[#allocation3] sm:$0xff] }
  0xae   : > { %v539_v29 = vadd.f32 %v538_v27, %v515_v26  ;;  %611 = vmatpush.msrb.mxu2 %v592_v0  ;;  %498 = vst.msk [vmem:[#allocation3 + $0x8] sm:$0xff] %vm417_vm0, %v489_v6 }
  0xb0   : > { %v541_v30 = vmul.f32 0.35355338, %v539_v29 }
  0xb2   : > { %v453_v18 = vpop.f32.mrf.mxu0 }
  0xb3   : > { %v454_v19 = vadd.f32 %v1053_v13, %v453_v18  ;;  %v491_v18 = vpop.f32.mrf.mxu1 }
  0xb4   : > { %v543_v28 = vld [vmem:[#allocation2 + $0x8] sm:$0xff] }
  0xb5   : > { %461 = vst.msk [vmem:[#allocation2 + $0x10] sm:$0xff] %vm417_vm0, %v454_v19  ;;  %v492_v19 = vadd.f32 %v1054_v59, %v491_v18 }
  0xb7   : > { %499 = vst.msk [vmem:[#allocation3 + $0x10] sm:$0xff] %vm417_vm0, %v492_v19 }
  0xba   : > { %v456_v20 = vpop.f32.mrf.mxu0 }
  0xbb   : > { %v457_v21 = vadd.f32 %v1053_v13, %v456_v20  ;;  %v494_v22 = vpop.f32.mrf.mxu1 }
  0xbc   : > { %v544_v25 = vld [vmem:[#allocation2 + $0x10] sm:$0xff] }
  0xbd   : > { %462 = vst.msk [vmem:[#allocation2 + $0x18] sm:$0xff] %vm417_vm0, %v457_v21  ;;  %v632_v21 = vld [vmem:[#allocation3 + $0x8] sm:$0xff] }
  0xbe   : > { %v674_v20 = vld [vmem:[#allocation3 + $0x10] sm:$0xff]  ;;  %653 = vmatpush.msra.mxu2 %v632_v21 }
  0xc4   : > { %v545_v23 = vld [vmem:[#allocation2 + $0x18] sm:$0xff] }
  0xc5   : > { %959 = vmatpush.xpose.msk.msra.mxu3 %vm417_vm0, %v545_v23  ;;  %v495_v23 = vadd.f32 %v1054_v59, %v494_v22 }
  0xc7   : > { %500 = vst.msk [vmem:[#allocation3 + $0x18] sm:$0xff] %vm417_vm0, %v495_v23 }
  0xc9   : > { %960 = vmatpush.xpose.msk.msra.mxu3 %vm417_vm0, %v544_v25 }
  0xcd   : > { %961 = vmatpush.xpose.msk.msra.mxu3 %vm417_vm0, %v543_v28 }
  0xce   : > { %v716_v25 = vld [vmem:[#allocation3 + $0x18] sm:$0xff] }
  0xd1   : > { %962 = vmatpush.xpose.msk.msra.mxu3 %vm417_vm0, %v542_v31 }
  0xd4   : > { %963 = vmatmul.msk.f32.vlgmr.msra.gmra.mxu3 %vm417_vm0, %v541_v30 }
  0xd5   : > { %695 = vmatpush.msrb.mxu3 %v674_v20 }
 0x157   : > { %v578_v32 = vpop.f32.mrf.mxu3 }
 0x158   : > { %v701_v33 = vsel %vm700_vm1, %v578_v32, -inf  ;;  %v617_v34 = vsel %vm616_vm2, %v578_v32, -inf  ;;  %v659_v35 = vsel %vm658_vm3, %v578_v32, -inf  ;;  %v581_v36 = vsel %vm417_vm0, %v578_v32, -inf }
 0x159   : > { %702 = vmax.xlane.f32.xlu1 %v701_v33  ;;  %618 = vmax.xlane.f32.xlu0 %v617_v34 }
 0x161   : > { %660 = vmax.xlane.f32.xlu0 %v659_v35 }
 0x169   : > { %582 = vmax.xlane.f32.xlu0 %v581_v36 }
 0x1cc   : > { %v619_v38 = vpop.xlane.xlu0 %618  ;;  %v703_v43 = vpop.xlane.xlu1 %702 }
 0x1cd   : > { %v620_v39 = vsub.f32 %v578_v32, %v619_v38  ;;  %v704_v46 = vsub.f32 %v578_v32, %v703_v43 }
 0x1cf   : > { %v621_v40 = vmul.f32 1.442695, %v620_v39  ;;  %v705_v47 = vmul.f32 1.442695, %v704_v46 }
 0x1d1   : > { %1055 = vpow2.f32 %v621_v40 }
 0x1d4   : > { %v661_v41 = vpop.xlane.xlu0 %660 }
 0x1d5   : > { %v662_v42 = vsub.f32 %v578_v32, %v661_v41 }
 0x1d7   : > { %v663_v44 = vmul.f32 1.442695, %v662_v42  ;;  %v1056_v45 = vpop.eup %1055 }
 0x1d8   : > { %624 = vrot.lane.b32.xlu1 %v1056_v45, %s1218_s16 }
 0x1d9   : > { %1057 = vpow2.f32 %v663_v44 }
 0x1da   : > { %1059 = vpow2.f32 %v705_v47 }
 0x1dc   : > { %v583_v50 = vpop.xlane.xlu0 %582 }
 0x1dd   : > { %v584_v51 = vsub.f32 %v578_v32, %v583_v50 }
 0x1df   : > { %v1058_v48 = vpop.eup %1057  ;;  %v585_v52 = vmul.f32 1.442695, %v584_v51 }
 0x1e0   : > { %666 = vrot.lane.b32.xlu2 %v1058_v48, %s1219_s18  ;;  %v1060_v49 = vpop.eup %1059 }
 0x1e1   : > { %1061 = vpow2.f32 %v585_v52 }
 0x1e7   : > { %v1062_v53 = vpop.eup %1061 }
 0x1e8   : > { %708 = vrot.lane.b32.xlu2 %v1060_v49, %s1220_s20  ;;  %v587_v54 = vsel %vm417_vm0, %v1062_v53, 0.0 }
 0x202   : > { %588 = vadd.xlane.f32.xlu1 %v587_v54 }
 0x23a   : > { %v667_v55 = vpop.permute.xlu2 %666 }
 0x23b   : > { %v669_v56 = vsel %vm417_vm0, %v667_v55, 0.0 }
 0x23c   : > { %670 = vadd.xlane.f32.xlu0 %v669_v56 }
 0x242   : > { %v709_v57 = vpop.permute.xlu2 %708 }
 0x243   : > { %v711_v58 = vsel %vm417_vm0, %v709_v57, 0.0 }
 0x244   : > { %712 = vadd.xlane.f32.xlu0 %v711_v58 }
 0x24a   : > { %v625_v62 = vpop.permute.xlu1 %624 }
 0x24b   : > { %v627_v63 = vsel %vm417_vm0, %v625_v62, 0.0 }
 0x24c   : > { %628 = vadd.xlane.f32.xlu2 %v627_v63 }
 0x275   : > { %v589_v1 = vpop.xlane.xlu1 %588 }
 0x276   : > { %1063 = vrcp.f32 %v589_v1 }
 0x27c   : > { %v1064_v2 = vpop.eup %1063 }
 0x27d   : > { %v591_v3 = vmul.f32 %v1064_v2, %v1062_v53 }
 0x27f   : > { %964 = vmatmul.msk.f32.vlgmr.msrb.gmra.mxu2 %vm417_vm0, %v591_v3 }
 0x280   : > { %737 = vmatpush.msrb.mxu2 %v716_v25 }
 0x2af   : > { %v671_v4 = vpop.xlane.xlu0 %670 }
 0x2b0   : > { %1065 = vrcp.f32 %v671_v4 }
 0x2b6   : > { %v1066_v7 = vpop.eup %1065 }
 0x2b7   : > { %v673_v8 = vmul.f32 %v1066_v7, %v1058_v48  ;;  %v713_v9 = vpop.xlane.xlu0 %712 }
 0x2b8   : > { %1067 = vrcp.f32 %v713_v9 }
 0x2b9   : > { %676 = vrot.lane.b32.xlu2 %v673_v8, %s1219_s18  ;;  %s799_s18 = sshll.u32 %s1399_s27, 4  ;;  %s800_s18 = int_to_ptr.vmem [resolvable:$true] %s799_s18 }
 0x2be   : > { %v1068_v11 = vpop.eup %1067 }
 0x2bf   : > { %v629_v10 = vpop.xlane.xlu2 %628  ;;  %v715_v15 = vmul.f32 %v1068_v11, %v1060_v49 }
 0x2c0   : > { %1069 = vrcp.f32 %v629_v10 }
 0x2c6   : > { %v1070_v12 = vpop.eup %1069 }
 0x2c7   : > { %v631_v13 = vmul.f32 %v1070_v12, %v1056_v45 }
 0x2c9   : > { %634 = vrot.lane.b32.xlu0 %v631_v13, %s1218_s16  ;;  %v742_v14 = vsel %vm417_vm0, %v591_v3, %v631_v13  ;;  %s797_s16 = scalar_lea.hbm %s1476_s9, %s970_s28 }
 0x2ca   : > { %v744_v16 = vsel %vm743_vm4, %v742_v14, %v673_v8 }
 0x2cb   : > { %v746_v17 = vsel %vm745_vm5, %v744_v16, %v715_v15 }
 0x2cc   : > { %748 = vst.msk [vmem:[%s1399_s27] sm:$0xff] %vm747_vm6, %v746_v17 }
 0x2d1   : > { %718 = vrot.lane.b32.xlu0 %v715_v15, %s1220_s20  ;;  %s801_s20 = sshll.u32 %s797_s16, 4  ;;  %s802_s20 = int_to_ptr.hbm [resolvable:$true] %s801_s20 }
 0x2d2   : > { %s1115_s25 = sshra.s32 %s802_s20, 4  ;;  %s1116_s25 = int_to_ptr.hbm [resolvable:$true] %s1115_s25 }
 0x2d3   : > { %s1117_s0 = scalar_lea.hbm %s1116_s25, 8  ;;  %p1122_p5 = scmp.lt.s32.totalorder %s1116_s25, %s1476_s9 }
 0x2d4   : > { %p1118_p1 = scmp.ne.s32.totalorder %s1116_s25, %s1117_s0  ;;  %p1123_p6 = scmp.lt.s32.totalorder %s1121_s29, %s1117_s0 }
 0x2d6   : > { %p1119_p2 = pnand %p1118_p1, %p1314_p4  ;;  %p1124_p7 = por %p1123_p6, %p1122_p5 }
 0x2d8   : > { %p1120_p3 = pneg %p1119_p2 }
 0x2da   : > { %p1125_p9 = pnand %p1124_p7, %p1120_p3 }
 0x302   : > { %v613_v29 = vpop.f32.mrf.mxu2 }
 0x313   : > { %v677_v24 = vpop.permute.xlu2 %676 }
 0x314   : > { %966 = vmatmul.msk.f32.vlgmr.msrb.gmra.mxu3 %vm417_vm0, %v677_v24 }
 0x33b   : > { %v635_v26 = vpop.permute.xlu0 %634 }
 0x33c   : > { %965 = vmatmul.msk.f32.vlgmr.msra.gmra.mxu2 %vm417_vm0, %v635_v26 }
 0x343   : > { %v719_v27 = vpop.permute.xlu0 %718 }
 0x344   : > { %967 = vmatmul.msk.f32.vlgmr.msrb.gmra.mxu2 %vm417_vm0, %v719_v27 }
 0x397   : > { %v697_v28 = vpop.f32.mrf.mxu3 }
 0x398   : > { %754 = vrot.lane.b32.xlu1 %v697_v28, %s1221_s6 }
 0x3bf   : > { %v655_v30 = vpop.f32.mrf.mxu2 }
 0x3c0   : > { %750 = vrot.lane.b32.xlu0 %v655_v30, %s1222_s23 }
 0x3c1   : > { %1128 = shalt.err (!%p1125_p9)
}
 0x3c2   : > { %981 = dma.vmem_to_hbm [thread:$0]  (%p1314_p4), %s800_s18, 128, %s802_s20, %s771_s24  }
 0x3c3   : > { %s1223_s16 = smov 24   ;;  %s782_s6 = scalar_lea.hbm %s1475_s8, %s970_s28 }
 0x3c4   : > { %s1484_s25 = sshll.u32 %s1390_s26, 3  ;;  %s786_s15 = sshll.u32 %s782_s6, 4  ;;  %s787_s15 = int_to_ptr.hbm [resolvable:$true] %s786_s15 }
 0x3c5   : > { %s383_s0 = scalar_lea.vmem [#allocation7], %s1484_s25  ;;  %s766_s18 = scalar_lea.sflag [#allocation6], %s1390_s26 }
 0x3c6   : > { %s784_s29 = sshll.u32 %s383_s0, 4  ;;  %s1143_s20 = sshra.s32 %s787_s15, 4  ;;  %s785_s29 = int_to_ptr.vmem [resolvable:$true] %s784_s29  ;;  %s1144_s20 = int_to_ptr.hbm [resolvable:$true] %s1143_s20 }
 0x3c7   : > { %v739_v31 = vpop.f32.mrf.mxu2  ;;  %s1145_s28 = scalar_lea.hbm %s1144_s20, 8  ;;  %p1150_p13 = scmp.lt.s32.totalorder %s1144_s20, %s1475_s8 }
 0x3c8   : > { %758 = vrot.lane.b32.xlu0 %v739_v31, %s1223_s16  ;;  %p1146_p10 = scmp.ne.s32.totalorder %s1144_s20, %s1145_s28  ;;  %s1149_s16 = scalar_lea.hbm %s1475_s8, 16 }
 0x3c9   : > { %p1151_p0 = scmp.lt.s32.totalorder %s1149_s16, %s1145_s28 }
 0x3ca   : > { %p1147_p11 = pnand %p1146_p10, %p1314_p4 }
 0x3cb   : > { %p1152_p1 = por %p1151_p0, %p1150_p13 }
 0x3cc   : > { %p1148_p12 = pneg %p1147_p11 }
 0x3ce   : > { %p1153_p2 = pnand %p1152_p1, %p1148_p12 }
 0x40a   : > { %v755_v34 = vpop.permute.xlu1 %754 }
 0x432   : > { %v751_v32 = vpop.permute.xlu0 %750 }
 0x433   : > { %v761_v33 = vsel %vm417_vm0, %v613_v29, %v751_v32 }
 0x434   : > { %v762_v35 = vsel %vm743_vm4, %v761_v33, %v755_v34 }
 0x43a   : > { %v759_v36 = vpop.permute.xlu0 %758 }
 0x43b   : > { %v763_v37 = vsel %vm745_vm5, %v762_v35, %v759_v36 }
 0x43c   : > { %764 = vst.msk [vmem:[%s383_s0] sm:$0xff] %vm747_vm6, %v763_v37 }
 0x43d   : > { %1156 = shalt.err (!%p1153_p2)
}
 0x43e   : > { %980 = dma.vmem_to_hbm [thread:$0]  (%p1314_p4), %s785_s29, 128, %s787_s15, %s766_s18  }
 0x43f PF: > { %p997_p3 = scmp.ge.s32.totalorder %s1215_s14, 2  ;;  %s813_s26 = sand.u32 1, %s1195_s30  }
 0x440   : > { %s814_s6 = scalar_lea.sflag [#allocation6], %s813_s26 }
 0x441   : > { %p989_p5 = pnand %p997_p3, %p1321_p8 }
 0x443   : > { %p990_p6 = pneg %p989_p5 }
 0x445   : > { %1186 = dma.done.wait (%p990_p6), %s814_s6, 128  }
 0x446   : > { %1188 = vsyncadd (%p990_p6), %s814_s6, 4294967168  ;;  %s824_s25 = scalar_lea.sflag [#allocation9], %s813_s26 }
 0x447   : > { %1190 = dma.done.wait (%p990_p6), %s824_s25, 128  }
 0x448   : > { %1192 = vsyncadd (%p990_p6), %s824_s25, 4294967168  ;;  %s27_s14 = sadd.s32 1, %s1215_s14   ;;  %s1485_s30 = smov %s1199_s10 }
 0x449   : > { %p24_p7 = scmp.ge.s32.totalorder %s27_s14, 4   ;;  %s1486_s10 = smov %s1203_s11 }
 0x44a   : > { %s1487_s11 = smov %s1327_s22  ;;  %s1488_s12 = smov %s1211_s13 }
 0x44b   : > { %s1489_s13 = smov %s1491_s17  ;;  %26 = sbr.rel (!%p24_p7) target bundleno = 10 (0xa), region = 119 }
 0x450   :  { %830 = vsyncpa [#allocation5], 1 }
 0x451   :  { %832 = vsyncpa [#allocation5 + $0x1], 1 }
 0x452   :  { %833 = vsyncpa [#allocation6], 1 }
 0x453   :  { %835 = vsyncpa [#allocation6 + $0x1], 1 }
 0x454   :  { %836 = vsyncpa [#allocation9], 1 }
 0x455   :  { %838 = vsyncpa [#allocation9 + $0x1], 1 }

</bundles_post_ra>
